<compile_context>
chip_gen: v6e
topology: v6e:2x2x1
jax: 0.10.0
libtpu: 0.0.40
codegen_flags: <defaults>
</compile_context>

<pallas_src>
import functools
import math

import jax
import jax.numpy as jnp
from jax import lax
from jax.experimental import pallas as pl
from jax.experimental.pallas import tpu as pltpu


# ---------------------------------------------------------------------------
# Fused recurrence kernel: one grid step = T timesteps of one batch block.
# ---------------------------------------------------------------------------
def _ctrnn_fused_kernel(x_ref, w_ih_ref, w_hh_ref, b_ref, h0_ref,
                        out_ref, h_scratch, *, alpha, n_steps, unroll):
    # x_ref   : (T, Bb, I)   input dtype (cast to compute dtype in-kernel)
    # w_ih_ref: (I, Hp)      compute dtype, resident (single-buffered)
    # w_hh_ref: (Hp, Hp)     compute dtype, resident (single-buffered)
    # b_ref   : (1, Hp)      f32 fused bias (b_ih + b_hh), resident
    # h0_ref  : (Bb, Hp)     f32 initial hidden for this batch block
    # out_ref : (T, Bb, Hp)  f32 (output rows ARE the hidden state)
    # h_scratch: (Bb, Hp)    f32 VMEM, hidden state carried across time blocks
    t_blk = pl.program_id(1)

    @pl.when(t_blk == 0)
    def _():
        h_scratch[...] = h0_ref[...]

    w_ih = w_ih_ref[...]
    w_hh = w_hh_ref[...]
    cdtype = w_hh.dtype
    bb, hp = h_scratch.shape
    # Hoisted broadcast (JAX does not CSE broadcast_in_dim inside the loop).
    bias = jnp.broadcast_to(b_ref[...], (bb, hp))

    def step(t, h):
        x_t = x_ref[t].astype(cdtype)                            # (Bb, I), VPU cast
        pre = (jnp.dot(x_t, w_ih, preferred_element_type=jnp.float32)
               + jnp.dot(h.astype(cdtype), w_hh,
                         preferred_element_type=jnp.float32)
               + bias)
        h_new = jnp.maximum(pre, 0.0)                            # transfer_function = relu
        h = h + alpha * (h_new - h)                              # == h*(1-a) + h_new*a
        out_ref[t] = h.astype(out_ref.dtype)
        return h

    # TODO(synk): for 8-row-aligned batch blocks the x projection could instead be
    # one (T*Bb, I) @ (I, Hp) prologue matmul into a VMEM scratch (better MXU fill);
    # kept per-step here to stay reshape/relayout-free for arbitrary Bb.
    h = lax.fori_loop(0, n_steps, step, h_scratch[...], unroll=unroll)
    h_scratch[...] = h


# ---------------------------------------------------------------------------
# Sizing helpers (generation-aware, budget-driven)
# ---------------------------------------------------------------------------
def _round_up(x, m):
    return ((x + m - 1) // m) * m


def _vmem_budget_bytes():
    """Usable per-TensorCore VMEM budget for block sizing (generation-aware)."""
    cap = 64 << 20                               # conservative default (v7x per-TC)
    try:
        info = pltpu.get_tpu_info()
        cap = int(getattr(info, "vmem_capacity_bytes", cap) or cap)
    except Exception:
        pass
    # Headroom for compiler-internal scratch; never request more than 100 MiB.
    return max(16 << 20, min(cap - (8 << 20), 100 << 20))


def _choose_time_block(S, t_cap):
    """Timesteps per grid step: minimize padded work + ~2 steps of overhead/block."""
    t_cap = max(1, min(int(t_cap), S))
    best_t, best_cost = 1, None
    for t in range(1, t_cap + 1):
        n_blk = -(-S // t)
        cost = n_blk * t + 2.0 * n_blk
        if best_cost is None or cost <= best_cost:
            best_t, best_cost = t, cost
    return best_t


def _batch_block_candidates(B):
    cands = []
    if B >= 16 and B % 16 == 0:
        cands.append(B // 2)      # >=2 batch blocks -> feeds both v7x TensorCores
    cands.append(B)               # full batch (always a legal sublane block)
    for div in (4, 8, 16, 32, 64):
        if B % div == 0 and (B // div) % 8 == 0:
            cands.append(B // div)
    return list(dict.fromkeys(cands))


def _plan_blocks(S, B, I, Hp, w_itemsize, x_itemsize, budget):
    """Pick (batch block Bb, time block T, VMEM estimate) under the budget."""
    ip = _round_up(I, 128)
    w_sub = max(8, 32 // w_itemsize)             # sublane tile rows for weight dtype

    def estimate(bb):
        bb8 = _round_up(bb, 8)
        fixed = (_round_up(I, w_sub) * Hp * w_itemsize          # W_ih (Buffered(1))
                 + _round_up(Hp, w_sub) * Hp * w_itemsize       # W_hh (Buffered(1))
                 + 8 * Hp * 4                                    # fused bias
                 + 2 * bb8 * Hp * 4                              # h0 (double-buffered)
                 + bb8 * Hp * 4)                                 # h scratch
        per_t = 2 * bb8 * ip * x_itemsize + 2 * bb8 * Hp * 4     # x in + out blocks
        return fixed, per_t

    cands = _batch_block_candidates(B)
    for bb in cands:
        fixed, per_t = estimate(bb)
        t_cap = (budget - fixed) // per_t
        if t_cap >= 1:
            t = _choose_time_block(S, min(int(t_cap), 256))
            return bb, t, fixed + per_t * t
    bb = cands[-1]
    fixed, per_t = estimate(bb)
    return bb, 1, fixed + per_t


def _resident_spec(shape, index_map):
    """Constant-index block: single-buffer it when this JAX supports pl.Buffered."""
    if hasattr(pl, "Buffered"):
        try:
            return pl.BlockSpec(shape, index_map, pipeline_mode=pl.Buffered(1))
        except TypeError:
            pass
    return pl.BlockSpec(shape, index_map)


# ---------------------------------------------------------------------------
# Forward pass
# ---------------------------------------------------------------------------
def ctrnn_forward(x, w_ih_t, b_ih, w_hh_t, b_hh, h0=None, *,
                  alpha, compute_dtype=jnp.bfloat16):
    """CTRNN forward.  x: (S, B, I); returns (output (S,B,H) f32, hidden (B,H) f32)."""
    S, B, I = x.shape
    H = w_hh_t.shape[1]
    Hp = _round_up(H, 128)                       # lane-dense hidden dimension

    if h0 is None:
        h0 = jnp.zeros((B, H), dtype=jnp.float32)

    # Pad H -> Hp with zeros (padded hidden lanes stay exactly 0), cast weights to
    # the MXU compute dtype, and fuse the two biases.
    w_ih_p = jnp.pad(w_ih_t.astype(jnp.float32), ((0, 0), (0, Hp - H))).astype(compute_dtype)
    w_hh_p = jnp.pad(w_hh_t.astype(jnp.float32), ((0, Hp - H), (0, Hp - H))).astype(compute_dtype)
    b_fused = jnp.pad((b_ih.astype(jnp.float32) + b_hh.astype(jnp.float32)),
                      (0, Hp - H)).reshape(1, Hp)
    h0_p = jnp.pad(h0.astype(jnp.float32), ((0, 0), (0, Hp - H)))

    budget = _vmem_budget_bytes()
    Bb, T, est = _plan_blocks(S, B, I, Hp,
                              jnp.dtype(compute_dtype).itemsize,
                              jnp.dtype(x.dtype).itemsize, budget)

    # Pad the time axis so T divides it.  Padded steps only write rows >= S (sliced
    # off below); the final hidden is row S-1 of the output, so it is unaffected.
    n_tblk = -(-S // T)
    S_pad = n_tblk * T
    x_p = jnp.pad(x, ((0, S_pad - S), (0, 0), (0, 0))) if S_pad != S else x

    unroll = max(1, min(8, T))                   # bounded unroll: avoid vreg spills
    kernel = functools.partial(_ctrnn_fused_kernel, alpha=float(alpha),
                               n_steps=T, unroll=unroll)
    vmem_limit = int(min(budget, max(32 << 20, int(1.25 * est) + (4 << 20))))

    out_full = pl.pallas_call(
        kernel,
        out_shape=jax.ShapeDtypeStruct((S_pad, B, Hp), jnp.float32),
        grid_spec=pltpu.PrefetchScalarGridSpec(
            num_scalar_prefetch=0,
            grid=(B // Bb, n_tblk),              # (batch blocks, time blocks)
            in_specs=[
                pl.BlockSpec((T, Bb, I), lambda b, t: (t, b, 0)),   # x (cast in-kernel)
                _resident_spec((I, Hp), lambda b, t: (0, 0)),       # W_ih^T
                _resident_spec((Hp, Hp), lambda b, t: (0, 0)),      # W_hh^T
                _resident_spec((1, Hp), lambda b, t: (0, 0)),       # fused bias
                pl.BlockSpec((Bb, Hp), lambda b, t: (b, 0)),        # h0
            ],
            out_specs=pl.BlockSpec((T, Bb, Hp), lambda b, t: (t, b, 0)),
            scratch_shapes=[pltpu.VMEM((Bb, Hp), jnp.float32)],
        ),
        compiler_params=pltpu.CompilerParams(
            dimension_semantics=("parallel", "arbitrary"),
            vmem_limit_bytes=vmem_limit,
        ),
    )(x_p, w_ih_p, w_hh_p, b_fused, h0_p)

    output = out_full[:S, :, :H]
    hidden = out_full[S - 1, :, :H]              # output rows ARE the hidden state
    return output, hidden


# ---------------------------------------------------------------------------
# Pure-JAX references
# ---------------------------------------------------------------------------
def ctrnn_reference(x, w_ih_t, b_ih, w_hh_t, b_hh, h0, *, alpha,
                    compute_dtype=jnp.float32):
    """Mirrors the PyTorch forward; compute_dtype lets it mimic the kernel's casts."""
    cd = compute_dtype
    xc = x.astype(cd)
    wi = w_ih_t.astype(cd)
    wh = w_hh_t.astype(cd)

    def step(h, x_t):
        pre = (jnp.dot(x_t, wi, preferred_element_type=jnp.float32)
               + b_ih
               + jnp.dot(h.astype(cd), wh, preferred_element_type=jnp.float32)
               + b_hh)
        h_new = jax.nn.relu(pre)
        h_next = h * (1.0 - alpha) + h_new * alpha
        return h_next, h_next

    h_last, outs = lax.scan(step, h0.astype(jnp.float32), xc)
    return outs, h_last


# ---------------------------------------------------------------------------
# Demo / self-test
# ---------------------------------------------------------------------------
if __name__ == "__main__":
    seq_len, batch, input_size, hidden_size = 8, 2, 4, 32
    tau, dt = 100.0, 20.0
    alpha = dt / tau

    key = jax.random.PRNGKey(0)
    k_x, k_wi, k_bi, k_wh, k_bh = jax.random.split(key, 5)

    x = jax.random.normal(k_x, (seq_len, batch, input_size), dtype=jnp.float32)

    # PyTorch Linear-style uniform init bounds.
    bound_i = 1.0 / math.sqrt(input_size)
    bound_h = 1.0 / math.sqrt(hidden_size)
    w_ih_t = jax.random.uniform(k_wi, (input_size, hidden_size),
                                minval=-bound_i, maxval=bound_i, dtype=jnp.float32)
    b_ih = jax.random.uniform(k_bi, (hidden_size,),
                              minval=-bound_i, maxval=bound_i, dtype=jnp.float32)
    w_hh_t = jax.random.uniform(k_wh, (hidden_size, hidden_size),
                                minval=-bound_h, maxval=bound_h, dtype=jnp.float32)
    b_hh = jax.random.uniform(k_bh, (hidden_size,),
                              minval=-bound_h, maxval=bound_h, dtype=jnp.float32)

    h0 = jnp.zeros((batch, hidden_size), dtype=jnp.float32)   # hidden=None -> zeros

    out, h_last = ctrnn_forward(x, w_ih_t, b_ih, w_hh_t, b_hh, h0,
                                alpha=alpha, compute_dtype=jnp.bfloat16)
    out = jax.block_until_ready(out)
    h_last = jax.block_until_ready(h_last)

    assert out.shape == (seq_len, batch, hidden_size)
    assert h_last.shape == (batch, hidden_size)
    assert out.dtype == jnp.float32 and h_last.dtype == jnp.float32

    # Tight check vs a reference mirroring the kernel's bf16-matmul/f32-accum numerics.
    out_m, h_m = ctrnn_reference(x, w_ih_t, b_ih, w_hh_t, b_hh, h0,
                                 alpha=alpha, compute_dtype=jnp.bfloat16)
    assert jnp.allclose(out, out_m, atol=1e-3, rtol=1e-3)
    assert jnp.allclose(h_last, h_m, atol=1e-3, rtol=1e-3)

    # Loose check vs the full-f32 PyTorch-faithful reference (bf16 rounding slack).
    out_f, h_f = ctrnn_reference(x, w_ih_t, b_ih, w_hh_t, b_hh, h0,
                                 alpha=alpha, compute_dtype=jnp.float32)
    assert jnp.allclose(out, out_f, atol=5e-2, rtol=5e-2)
    assert jnp.allclose(h_last, h_f, atol=5e-2, rtol=5e-2)

    print("KERNEL_OK")
</pallas_src>

<mosaic_0001>
module attributes {stable_mosaic.version = 11 : i64} {
  func.func @_ctrnn_fused_kernel(%arg0: i32, %arg1: i32, %arg2: memref<8x2x4xf32, #tpu.memory_space<vmem>>, %arg3: memref<4x128xbf16, #tpu.memory_space<vmem>>, %arg4: memref<128x128xbf16, #tpu.memory_space<vmem>>, %arg5: memref<1x128xf32, #tpu.memory_space<vmem>>, %arg6: memref<2x128xf32, #tpu.memory_space<vmem>>, %arg7: memref<8x2x128xf32, #tpu.memory_space<vmem>>, %arg8: memref<2x128xf32, #tpu.memory_space<vmem>>) attributes {dimension_semantics = [#tpu.dimension_semantics<parallel>, #tpu.dimension_semantics<arbitrary>], iteration_bounds = array<i64: 1, 1>, scalar_prefetch = 0 : i64, scratch_operands = 1 : i64, tpu.core_type = #tpu.core_type<tc>, window_params = [{transform_indices = @transform_0, window_bounds = array<i64: 8, 2, 4>}, {pipeline_mode = #tpu.pipeline_mode<synchronous>, transform_indices = @transform_1, window_bounds = array<i64: 4, 128>}, {pipeline_mode = #tpu.pipeline_mode<synchronous>, transform_indices = @transform_2, window_bounds = array<i64: 128, 128>}, {pipeline_mode = #tpu.pipeline_mode<synchronous>, transform_indices = @transform_3, window_bounds = array<i64: 1, 128>}, {transform_indices = @transform_4, window_bounds = array<i64: 2, 128>}, {transform_indices = @transform_5, window_bounds = array<i64: 8, 2, 128>}]} {
    %c0_i32 = arith.constant 0 : i32
    %0 = arith.cmpi eq, %arg1, %c0_i32 : i32
    %1 = arith.extui %0 : i1 to i32
    %c0_i32_0 = arith.constant 0 : i32
    %2 = arith.cmpi ne, %1, %c0_i32_0 : i32
    scf.if %2 {
      %c0_74 = arith.constant 0 : index
      %c0_75 = arith.constant 0 : index
      %162 = vector.load %arg6[%c0_74, %c0_75] : memref<2x128xf32, #tpu.memory_space<vmem>>, vector<2x128xf32>
      %c0_76 = arith.constant 0 : index
      %c0_77 = arith.constant 0 : index
      %163 = vector.load %arg8[%c0_76, %c0_77] : memref<2x128xf32, #tpu.memory_space<vmem>>, vector<2x128xf32>
      tpu.vector_store %arg8[%c0_76, %c0_77], %162 {strides = array<i32>} : memref<2x128xf32, #tpu.memory_space<vmem>>, vector<2x128xf32>,
    } else {
    }
    %c0 = arith.constant 0 : index
    %c0_1 = arith.constant 0 : index
    %3 = vector.load %arg3[%c0, %c0_1] : memref<4x128xbf16, #tpu.memory_space<vmem>>, vector<4x128xbf16>
    %c0_2 = arith.constant 0 : index
    %c0_3 = arith.constant 0 : index
    %4 = vector.load %arg4[%c0_2, %c0_3] : memref<128x128xbf16, #tpu.memory_space<vmem>>, vector<128x128xbf16>
    %c0_4 = arith.constant 0 : index
    %c0_5 = arith.constant 0 : index
    %5 = vector.load %arg5[%c0_4, %c0_5] : memref<1x128xf32, #tpu.memory_space<vmem>>, vector<1x128xf32>
    %6 = vector.shape_cast %5 : vector<1x128xf32> to vector<1x128xf32>
    %7 = vector.broadcast %6 : vector<1x128xf32> to vector<2x128xf32>
    %c0_6 = arith.constant 0 : index
    %c0_7 = arith.constant 0 : index
    %8 = vector.load %arg8[%c0_6, %c0_7] : memref<2x128xf32, #tpu.memory_space<vmem>>, vector<2x128xf32>
    %c0_i32_8 = arith.constant 0 : i32
    %9 = arith.index_cast %c0_i32_8 : i32 to index
    %c0_9 = arith.constant 0 : index
    %c0_10 = arith.constant 0 : index
    %10 = vector.load %arg2[%9, %c0_9, %c0_10] : memref<8x2x4xf32, #tpu.memory_space<vmem>>, vector<1x2x4xf32>
    %11 = vector.shape_cast %10 : vector<1x2x4xf32> to vector<2x4xf32>
    %12 = arith.truncf %11 : vector<2x4xf32> to vector<2x4xbf16>
    %cst = arith.constant dense<0.000000e+00> : vector<2x128xf32>
    %13 = tpu.matmul %12, %3, %cst {dimension_numbers = #tpu.dot_dimension_numbers<[1], [0], [0], [1], [0, 0, 1, 1], [], []>} : vector<2x4xbf16>, vector<4x128xbf16>, vector<2x128xf32> -> vector<2x128xf32>
    %14 = arith.truncf %8 : vector<2x128xf32> to vector<2x128xbf16>
    %cst_11 = arith.constant dense<0.000000e+00> : vector<2x128xf32>
    %15 = tpu.matmul %14, %4, %cst_11 {dimension_numbers = #tpu.dot_dimension_numbers<[1], [0], [0], [1], [0, 0, 1, 1], [], []>} : vector<2x128xbf16>, vector<128x128xbf16>, vector<2x128xf32> -> vector<2x128xf32>
    %16 = arith.addf %13, %15 : vector<2x128xf32>
    %17 = arith.addf %16, %7 : vector<2x128xf32>
    %cst_12 = arith.constant 0.000000e+00 : f32
    %18 = vector.broadcast %cst_12 : f32 to vector<2x128xf32>
    %19 = arith.maximumf %17, %18 : vector<2x128xf32>
    %20 = arith.subf %19, %8 : vector<2x128xf32>
    %cst_13 = arith.constant 2.000000e-01 : f32
    %21 = vector.broadcast %cst_13 : f32 to vector<2x128xf32>
    %22 = arith.mulf %21, %20 : vector<2x128xf32>
    %23 = arith.addf %8, %22 : vector<2x128xf32>
    %24 = arith.index_cast %c0_i32_8 : i32 to index
    %c0_14 = arith.constant 0 : index
    %c0_15 = arith.constant 0 : index
    %25 = vector.load %arg7[%24, %c0_14, %c0_15] : memref<8x2x128xf32, #tpu.memory_space<vmem>>, vector<1x2x128xf32>
    %26 = vector.shape_cast %25 : vector<1x2x128xf32> to vector<2x128xf32>
    %27 = vector.shape_cast %23 : vector<2x128xf32> to vector<1x2x128xf32>
    tpu.vector_store %arg7[%24, %c0_14, %c0_15], %27 {strides = array<i32>} : memref<8x2x128xf32, #tpu.memory_space<vmem>>, vector<1x2x128xf32>,
    %c1_i32 = arith.constant 1 : i32
    %28 = arith.index_cast %c1_i32 : i32 to index
    %c0_16 = arith.constant 0 : index
    %c0_17 = arith.constant 0 : index
    %29 = vector.load %arg2[%28, %c0_16, %c0_17] : memref<8x2x4xf32, #tpu.memory_space<vmem>>, vector<1x2x4xf32>
    %30 = vector.shape_cast %29 : vector<1x2x4xf32> to vector<2x4xf32>
    %31 = arith.truncf %30 : vector<2x4xf32> to vector<2x4xbf16>
    %cst_18 = arith.constant dense<0.000000e+00> : vector<2x128xf32>
    %32 = tpu.matmul %31, %3, %cst_18 {dimension_numbers = #tpu.dot_dimension_numbers<[1], [0], [0], [1], [0, 0, 1, 1], [], []>} : vector<2x4xbf16>, vector<4x128xbf16>, vector<2x128xf32> -> vector<2x128xf32>
    %33 = arith.truncf %23 : vector<2x128xf32> to vector<2x128xbf16>
    %cst_19 = arith.constant dense<0.000000e+00> : vector<2x128xf32>
    %34 = tpu.matmul %33, %4, %cst_19 {dimension_numbers = #tpu.dot_dimension_numbers<[1], [0], [0], [1], [0, 0, 1, 1], [], []>} : vector<2x128xbf16>, vector<128x128xbf16>, vector<2x128xf32> -> vector<2x128xf32>
    %35 = arith.addf %32, %34 : vector<2x128xf32>
    %36 = arith.addf %35, %7 : vector<2x128xf32>
    %cst_20 = arith.constant 0.000000e+00 : f32
    %37 = vector.broadcast %cst_20 : f32 to vector<2x128xf32>
    %38 = arith.maximumf %36, %37 : vector<2x128xf32>
    %39 = arith.subf %38, %23 : vector<2x128xf32>
    %cst_21 = arith.constant 2.000000e-01 : f32
    %40 = vector.broadcast %cst_21 : f32 to vector<2x128xf32>
    %41 = arith.mulf %40, %39 : vector<2x128xf32>
    %42 = arith.addf %23, %41 : vector<2x128xf32>
    %43 = arith.index_cast %c1_i32 : i32 to index
    %c0_22 = arith.constant 0 : index
    %c0_23 = arith.constant 0 : index
    %44 = vector.load %arg7[%43, %c0_22, %c0_23] : memref<8x2x128xf32, #tpu.memory_space<vmem>>, vector<1x2x128xf32>
    %45 = vector.shape_cast %44 : vector<1x2x128xf32> to vector<2x128xf32>
    %46 = vector.shape_cast %42 : vector<2x128xf32> to vector<1x2x128xf32>
    tpu.vector_store %arg7[%43, %c0_22, %c0_23], %46 {strides = array<i32>} : memref<8x2x128xf32, #tpu.memory_space<vmem>>, vector<1x2x128xf32>,
    %c2_i32 = arith.constant 2 : i32
    %47 = arith.index_cast %c2_i32 : i32 to index
    %c0_24 = arith.constant 0 : index
    %c0_25 = arith.constant 0 : index
    %48 = vector.load %arg2[%47, %c0_24, %c0_25] : memref<8x2x4xf32, #tpu.memory_space<vmem>>, vector<1x2x4xf32>
    %49 = vector.shape_cast %48 : vector<1x2x4xf32> to vector<2x4xf32>
    %50 = arith.truncf %49 : vector<2x4xf32> to vector<2x4xbf16>
    %cst_26 = arith.constant dense<0.000000e+00> : vector<2x128xf32>
    %51 = tpu.matmul %50, %3, %cst_26 {dimension_numbers = #tpu.dot_dimension_numbers<[1], [0], [0], [1], [0, 0, 1, 1], [], []>} : vector<2x4xbf16>, vector<4x128xbf16>, vector<2x128xf32> -> vector<2x128xf32>
    %52 = arith.truncf %42 : vector<2x128xf32> to vector<2x128xbf16>
    %cst_27 = arith.constant dense<0.000000e+00> : vector<2x128xf32>
    %53 = tpu.matmul %52, %4, %cst_27 {dimension_numbers = #tpu.dot_dimension_numbers<[1], [0], [0], [1], [0, 0, 1, 1], [], []>} : vector<2x128xbf16>, vector<128x128xbf16>, vector<2x128xf32> -> vector<2x128xf32>
    %54 = arith.addf %51, %53 : vector<2x128xf32>
    %55 = arith.addf %54, %7 : vector<2x128xf32>
    %cst_28 = arith.constant 0.000000e+00 : f32
    %56 = vector.broadcast %cst_28 : f32 to vector<2x128xf32>
    %57 = arith.maximumf %55, %56 : vector<2x128xf32>
    %58 = arith.subf %57, %42 : vector<2x128xf32>
    %cst_29 = arith.constant 2.000000e-01 : f32
    %59 = vector.broadcast %cst_29 : f32 to vector<2x128xf32>
    %60 = arith.mulf %59, %58 : vector<2x128xf32>
    %61 = arith.addf %42, %60 : vector<2x128xf32>
    %62 = arith.index_cast %c2_i32 : i32 to index
    %c0_30 = arith.constant 0 : index
    %c0_31 = arith.constant 0 : index
    %63 = vector.load %arg7[%62, %c0_30, %c0_31] : memref<8x2x128xf32, #tpu.memory_space<vmem>>, vector<1x2x128xf32>
    %64 = vector.shape_cast %63 : vector<1x2x128xf32> to vector<2x128xf32>
    %65 = vector.shape_cast %61 : vector<2x128xf32> to vector<1x2x128xf32>
    tpu.vector_store %arg7[%62, %c0_30, %c0_31], %65 {strides = array<i32>} : memref<8x2x128xf32, #tpu.memory_space<vmem>>, vector<1x2x128xf32>,
    %c3_i32 = arith.constant 3 : i32
    %66 = arith.index_cast %c3_i32 : i32 to index
    %c0_32 = arith.constant 0 : index
    %c0_33 = arith.constant 0 : index
    %67 = vector.load %arg2[%66, %c0_32, %c0_33] : memref<8x2x4xf32, #tpu.memory_space<vmem>>, vector<1x2x4xf32>
    %68 = vector.shape_cast %67 : vector<1x2x4xf32> to vector<2x4xf32>
    %69 = arith.truncf %68 : vector<2x4xf32> to vector<2x4xbf16>
    %cst_34 = arith.constant dense<0.000000e+00> : vector<2x128xf32>
    %70 = tpu.matmul %69, %3, %cst_34 {dimension_numbers = #tpu.dot_dimension_numbers<[1], [0], [0], [1], [0, 0, 1, 1], [], []>} : vector<2x4xbf16>, vector<4x128xbf16>, vector<2x128xf32> -> vector<2x128xf32>
    %71 = arith.truncf %61 : vector<2x128xf32> to vector<2x128xbf16>
    %cst_35 = arith.constant dense<0.000000e+00> : vector<2x128xf32>
    %72 = tpu.matmul %71, %4, %cst_35 {dimension_numbers = #tpu.dot_dimension_numbers<[1], [0], [0], [1], [0, 0, 1, 1], [], []>} : vector<2x128xbf16>, vector<128x128xbf16>, vector<2x128xf32> -> vector<2x128xf32>
    %73 = arith.addf %70, %72 : vector<2x128xf32>
    %74 = arith.addf %73, %7 : vector<2x128xf32>
    %cst_36 = arith.constant 0.000000e+00 : f32
    %75 = vector.broadcast %cst_36 : f32 to vector<2x128xf32>
    %76 = arith.maximumf %74, %75 : vector<2x128xf32>
    %77 = arith.subf %76, %61 : vector<2x128xf32>
    %cst_37 = arith.constant 2.000000e-01 : f32
    %78 = vector.broadcast %cst_37 : f32 to vector<2x128xf32>
    %79 = arith.mulf %78, %77 : vector<2x128xf32>
    %80 = arith.addf %61, %79 : vector<2x128xf32>
    %81 = arith.index_cast %c3_i32 : i32 to index
    %c0_38 = arith.constant 0 : index
    %c0_39 = arith.constant 0 : index
    %82 = vector.load %arg7[%81, %c0_38, %c0_39] : memref<8x2x128xf32, #tpu.memory_space<vmem>>, vector<1x2x128xf32>
    %83 = vector.shape_cast %82 : vector<1x2x128xf32> to vector<2x128xf32>
    %84 = vector.shape_cast %80 : vector<2x128xf32> to vector<1x2x128xf32>
    tpu.vector_store %arg7[%81, %c0_38, %c0_39], %84 {strides = array<i32>} : memref<8x2x128xf32, #tpu.memory_space<vmem>>, vector<1x2x128xf32>,
    %c4_i32 = arith.constant 4 : i32
    %85 = arith.index_cast %c4_i32 : i32 to index
    %c0_40 = arith.constant 0 : index
    %c0_41 = arith.constant 0 : index
    %86 = vector.load %arg2[%85, %c0_40, %c0_41] : memref<8x2x4xf32, #tpu.memory_space<vmem>>, vector<1x2x4xf32>
    %87 = vector.shape_cast %86 : vector<1x2x4xf32> to vector<2x4xf32>
    %88 = arith.truncf %87 : vector<2x4xf32> to vector<2x4xbf16>
    %cst_42 = arith.constant dense<0.000000e+00> : vector<2x128xf32>
    %89 = tpu.matmul %88, %3, %cst_42 {dimension_numbers = #tpu.dot_dimension_numbers<[1], [0], [0], [1], [0, 0, 1, 1], [], []>} : vector<2x4xbf16>, vector<4x128xbf16>, vector<2x128xf32> -> vector<2x128xf32>
    %90 = arith.truncf %80 : vector<2x128xf32> to vector<2x128xbf16>
    %cst_43 = arith.constant dense<0.000000e+00> : vector<2x128xf32>
    %91 = tpu.matmul %90, %4, %cst_43 {dimension_numbers = #tpu.dot_dimension_numbers<[1], [0], [0], [1], [0, 0, 1, 1], [], []>} : vector<2x128xbf16>, vector<128x128xbf16>, vector<2x128xf32> -> vector<2x128xf32>
    %92 = arith.addf %89, %91 : vector<2x128xf32>
    %93 = arith.addf %92, %7 : vector<2x128xf32>
    %cst_44 = arith.constant 0.000000e+00 : f32
    %94 = vector.broadcast %cst_44 : f32 to vector<2x128xf32>
    %95 = arith.maximumf %93, %94 : vector<2x128xf32>
    %96 = arith.subf %95, %80 : vector<2x128xf32>
    %cst_45 = arith.constant 2.000000e-01 : f32
    %97 = vector.broadcast %cst_45 : f32 to vector<2x128xf32>
    %98 = arith.mulf %97, %96 : vector<2x128xf32>
    %99 = arith.addf %80, %98 : vector<2x128xf32>
    %100 = arith.index_cast %c4_i32 : i32 to index
    %c0_46 = arith.constant 0 : index
    %c0_47 = arith.constant 0 : index
    %101 = vector.load %arg7[%100, %c0_46, %c0_47] : memref<8x2x128xf32, #tpu.memory_space<vmem>>, vector<1x2x128xf32>
    %102 = vector.shape_cast %101 : vector<1x2x128xf32> to vector<2x128xf32>
    %103 = vector.shape_cast %99 : vector<2x128xf32> to vector<1x2x128xf32>
    tpu.vector_store %arg7[%100, %c0_46, %c0_47], %103 {strides = array<i32>} : memref<8x2x128xf32, #tpu.memory_space<vmem>>, vector<1x2x128xf32>,
    %c5_i32 = arith.constant 5 : i32
    %104 = arith.index_cast %c5_i32 : i32 to index
    %c0_48 = arith.constant 0 : index
    %c0_49 = arith.constant 0 : index
    %105 = vector.load %arg2[%104, %c0_48, %c0_49] : memref<8x2x4xf32, #tpu.memory_space<vmem>>, vector<1x2x4xf32>
    %106 = vector.shape_cast %105 : vector<1x2x4xf32> to vector<2x4xf32>
    %107 = arith.truncf %106 : vector<2x4xf32> to vector<2x4xbf16>
    %cst_50 = arith.constant dense<0.000000e+00> : vector<2x128xf32>
    %108 = tpu.matmul %107, %3, %cst_50 {dimension_numbers = #tpu.dot_dimension_numbers<[1], [0], [0], [1], [0, 0, 1, 1], [], []>} : vector<2x4xbf16>, vector<4x128xbf16>, vector<2x128xf32> -> vector<2x128xf32>
    %109 = arith.truncf %99 : vector<2x128xf32> to vector<2x128xbf16>
    %cst_51 = arith.constant dense<0.000000e+00> : vector<2x128xf32>
    %110 = tpu.matmul %109, %4, %cst_51 {dimension_numbers = #tpu.dot_dimension_numbers<[1], [0], [0], [1], [0, 0, 1, 1], [], []>} : vector<2x128xbf16>, vector<128x128xbf16>, vector<2x128xf32> -> vector<2x128xf32>
    %111 = arith.addf %108, %110 : vector<2x128xf32>
    %112 = arith.addf %111, %7 : vector<2x128xf32>
    %cst_52 = arith.constant 0.000000e+00 : f32
    %113 = vector.broadcast %cst_52 : f32 to vector<2x128xf32>
    %114 = arith.maximumf %112, %113 : vector<2x128xf32>
    %115 = arith.subf %114, %99 : vector<2x128xf32>
    %cst_53 = arith.constant 2.000000e-01 : f32
    %116 = vector.broadcast %cst_53 : f32 to vector<2x128xf32>
    %117 = arith.mulf %116, %115 : vector<2x128xf32>
    %118 = arith.addf %99, %117 : vector<2x128xf32>
    %119 = arith.index_cast %c5_i32 : i32 to index
    %c0_54 = arith.constant 0 : index
    %c0_55 = arith.constant 0 : index
    %120 = vector.load %arg7[%119, %c0_54, %c0_55] : memref<8x2x128xf32, #tpu.memory_space<vmem>>, vector<1x2x128xf32>
    %121 = vector.shape_cast %120 : vector<1x2x128xf32> to vector<2x128xf32>
    %122 = vector.shape_cast %118 : vector<2x128xf32> to vector<1x2x128xf32>
    tpu.vector_store %arg7[%119, %c0_54, %c0_55], %122 {strides = array<i32>} : memref<8x2x128xf32, #tpu.memory_space<vmem>>, vector<1x2x128xf32>,
    %c6_i32 = arith.constant 6 : i32
    %123 = arith.index_cast %c6_i32 : i32 to index
    %c0_56 = arith.constant 0 : index
    %c0_57 = arith.constant 0 : index
    %124 = vector.load %arg2[%123, %c0_56, %c0_57] : memref<8x2x4xf32, #tpu.memory_space<vmem>>, vector<1x2x4xf32>
    %125 = vector.shape_cast %124 : vector<1x2x4xf32> to vector<2x4xf32>
    %126 = arith.truncf %125 : vector<2x4xf32> to vector<2x4xbf16>
    %cst_58 = arith.constant dense<0.000000e+00> : vector<2x128xf32>
    %127 = tpu.matmul %126, %3, %cst_58 {dimension_numbers = #tpu.dot_dimension_numbers<[1], [0], [0], [1], [0, 0, 1, 1], [], []>} : vector<2x4xbf16>, vector<4x128xbf16>, vector<2x128xf32> -> vector<2x128xf32>
    %128 = arith.truncf %118 : vector<2x128xf32> to vector<2x128xbf16>
    %cst_59 = arith.constant dense<0.000000e+00> : vector<2x128xf32>
    %129 = tpu.matmul %128, %4, %cst_59 {dimension_numbers = #tpu.dot_dimension_numbers<[1], [0], [0], [1], [0, 0, 1, 1], [], []>} : vector<2x128xbf16>, vector<128x128xbf16>, vector<2x128xf32> -> vector<2x128xf32>
    %130 = arith.addf %127, %129 : vector<2x128xf32>
    %131 = arith.addf %130, %7 : vector<2x128xf32>
    %cst_60 = arith.constant 0.000000e+00 : f32
    %132 = vector.broadcast %cst_60 : f32 to vector<2x128xf32>
    %133 = arith.maximumf %131, %132 : vector<2x128xf32>
    %134 = arith.subf %133, %118 : vector<2x128xf32>
    %cst_61 = arith.constant 2.000000e-01 : f32
    %135 = vector.broadcast %cst_61 : f32 to vector<2x128xf32>
    %136 = arith.mulf %135, %134 : vector<2x128xf32>
    %137 = arith.addf %118, %136 : vector<2x128xf32>
    %138 = arith.index_cast %c6_i32 : i32 to index
    %c0_62 = arith.constant 0 : index
    %c0_63 = arith.constant 0 : index
    %139 = vector.load %arg7[%138, %c0_62, %c0_63] : memref<8x2x128xf32, #tpu.memory_space<vmem>>, vector<1x2x128xf32>
    %140 = vector.shape_cast %139 : vector<1x2x128xf32> to vector<2x128xf32>
    %141 = vector.shape_cast %137 : vector<2x128xf32> to vector<1x2x128xf32>
    tpu.vector_store %arg7[%138, %c0_62, %c0_63], %141 {strides = array<i32>} : memref<8x2x128xf32, #tpu.memory_space<vmem>>, vector<1x2x128xf32>,
    %c7_i32 = arith.constant 7 : i32
    %142 = arith.index_cast %c7_i32 : i32 to index
    %c0_64 = arith.constant 0 : index
    %c0_65 = arith.constant 0 : index
    %143 = vector.load %arg2[%142, %c0_64, %c0_65] : memref<8x2x4xf32, #tpu.memory_space<vmem>>, vector<1x2x4xf32>
    %144 = vector.shape_cast %143 : vector<1x2x4xf32> to vector<2x4xf32>
    %145 = arith.truncf %144 : vector<2x4xf32> to vector<2x4xbf16>
    %cst_66 = arith.constant dense<0.000000e+00> : vector<2x128xf32>
    %146 = tpu.matmul %145, %3, %cst_66 {dimension_numbers = #tpu.dot_dimension_numbers<[1], [0], [0], [1], [0, 0, 1, 1], [], []>} : vector<2x4xbf16>, vector<4x128xbf16>, vector<2x128xf32> -> vector<2x128xf32>
    %147 = arith.truncf %137 : vector<2x128xf32> to vector<2x128xbf16>
    %cst_67 = arith.constant dense<0.000000e+00> : vector<2x128xf32>
    %148 = tpu.matmul %147, %4, %cst_67 {dimension_numbers = #tpu.dot_dimension_numbers<[1], [0], [0], [1], [0, 0, 1, 1], [], []>} : vector<2x128xbf16>, vector<128x128xbf16>, vector<2x128xf32> -> vector<2x128xf32>
    %149 = arith.addf %146, %148 : vector<2x128xf32>
    %150 = arith.addf %149, %7 : vector<2x128xf32>
    %cst_68 = arith.constant 0.000000e+00 : f32
    %151 = vector.broadcast %cst_68 : f32 to vector<2x128xf32>
    %152 = arith.maximumf %150, %151 : vector<2x128xf32>
    %153 = arith.subf %152, %137 : vector<2x128xf32>
    %cst_69 = arith.constant 2.000000e-01 : f32
    %154 = vector.broadcast %cst_69 : f32 to vector<2x128xf32>
    %155 = arith.mulf %154, %153 : vector<2x128xf32>
    %156 = arith.addf %137, %155 : vector<2x128xf32>
    %157 = arith.index_cast %c7_i32 : i32 to index
    %c0_70 = arith.constant 0 : index
    %c0_71 = arith.constant 0 : index
    %158 = vector.load %arg7[%157, %c0_70, %c0_71] : memref<8x2x128xf32, #tpu.memory_space<vmem>>, vector<1x2x128xf32>
    %159 = vector.shape_cast %158 : vector<1x2x128xf32> to vector<2x128xf32>
    %160 = vector.shape_cast %156 : vector<2x128xf32> to vector<1x2x128xf32>
    tpu.vector_store %arg7[%157, %c0_70, %c0_71], %160 {strides = array<i32>} : memref<8x2x128xf32, #tpu.memory_space<vmem>>, vector<1x2x128xf32>,
    %c8_i32 = arith.constant 8 : i32
    %c0_72 = arith.constant 0 : index
    %c0_73 = arith.constant 0 : index
    %161 = vector.load %arg8[%c0_72, %c0_73] : memref<2x128xf32, #tpu.memory_space<vmem>>, vector<2x128xf32>
    tpu.vector_store %arg8[%c0_72, %c0_73], %156 {strides = array<i32>} : memref<2x128xf32, #tpu.memory_space<vmem>>, vector<2x128xf32>,
    return
  }
  func.func @transform_0(%arg0: i32, %arg1: i32) -> (i32, i32, i32) {
    %c0_i32 = arith.constant 0 : i32
    %c0_i32_0 = arith.constant 0 : i32
    return %arg1, %arg0, %c0_i32 : i32, i32, i32
  }
  func.func @transform_1(%arg0: i32, %arg1: i32) -> (i32, i32) {
    %c0_i32 = arith.constant 0 : i32
    %c0_i32_0 = arith.constant 0 : i32
    %c0_i32_1 = arith.constant 0 : i32
    return %c0_i32, %c0_i32_0 : i32, i32
  }
  func.func @transform_2(%arg0: i32, %arg1: i32) -> (i32, i32) {
    %c0_i32 = arith.constant 0 : i32
    %c0_i32_0 = arith.constant 0 : i32
    %c0_i32_1 = arith.constant 0 : i32
    return %c0_i32, %c0_i32_0 : i32, i32
  }
  func.func @transform_3(%arg0: i32, %arg1: i32) -> (i32, i32) {
    %c0_i32 = arith.constant 0 : i32
    %c0_i32_0 = arith.constant 0 : i32
    %c0_i32_1 = arith.constant 0 : i32
    return %c0_i32, %c0_i32_0 : i32, i32
  }
  func.func @transform_4(%arg0: i32, %arg1: i32) -> (i32, i32) {
    %c0_i32 = arith.constant 0 : i32
    %c0_i32_0 = arith.constant 0 : i32
    return %arg0, %c0_i32 : i32, i32
  }
  func.func @transform_5(%arg0: i32, %arg1: i32) -> (i32, i32, i32) {
    %c0_i32 = arith.constant 0 : i32
    %c0_i32_0 = arith.constant 0 : i32
    return %arg1, %arg0, %c0_i32 : i32, i32, i32
  }
}

</mosaic_0001>

<bundles_post_ra>
// kernel: tpu_custom_call.1
= control target key start
LH: loop header
LB: loop body
LE: loop exit
PB: predicated region body
PF: predicated region fallthrough
CT: control target
= control target key end

     0   :  { %10 = vsyncpa [#allocation4], 0  ;;  %s1557_s0 = inlined_call_operand.vmem [shape: f32[8,2,4], index: 0, kind: input, shape index: {}]   ;;  %s1558_s1 = inlined_call_operand.vmem [shape: bf16[4,128], index: 1, kind: input, shape index: {}]   ;;  %s1559_s2 = inlined_call_operand.hbm [shape: bf16[128,128], index: 2, kind: input, shape index: {}]   ;;  %s1560_s3 = inlined_call_operand.vmem [shape: f32[1,128], index: 3, kind: input, shape index: {}]   ;;  %s1561_s4 = inlined_call_operand.vmem [shape: f32[2,128], index: 4, kind: input, shape index: {}]   ;;  %s1562_s5 = inlined_call_operand.hbm [shape: f32[8,2,128], index: 5, kind: output, shape index: {}]  }
   0x1   :  { %11 = vsyncpa [#allocation5], 0  ;;  %s1268_s18 = smov [#allocation3]  }
   0x2   :  { %s21_s19 = sshll.u32 %s1268_s18, 4  ;;  %s22_s19 = int_to_ptr.vmem [resolvable:$true] %s21_s19 }
   0x3   :  { %s1232_s20 = scalar_lea.vmem %s22_s19, 1024  ;;  %p1237_p1 = scmp.lt.s32.totalorder %s22_s19, %s22_s19 }
   0x4   :  { %p1233_p0 = scmp.ne.s32.totalorder %s22_s19, %s1232_s20  ;;  %p1238_p2 = scmp.lt.s32.totalorder %s1232_s20, %s1232_s20 }
   0x6   :  { %p1239_p3 = por %p1238_p2, %p1237_p1 }
   0x8   :  { %p1240_p4 = pnand %p1239_p3, %p1233_p0 }
   0xa   :  { %1243 = shalt.err (!%p1240_p4)
}
   0xb   :  { %s1269_s21 = smov 64   ;;  %s1270_s22 = smov 4  }
   0xc   :  { %27 = dma.hbm_to_vmem [thread:$0]  %s1559_s2, 1024, %s22_s19, [#allocation4], %s1269_s21, %s1269_s21, %s1270_s22  }
   0xd   :  { %1264 = dma.done.wait [#allocation4], 1024  }
   0xe   :  { %1265 = vsyncadd [#allocation4], 4294966272  ;;  %v1271_v0 = vmov 0.0   ;;  %vm1272_vm0 = vmmov 0   ;;  %v1315_v1 = vld [vmem:[#allocation3 + $0x38] sm:$0xff]   ;;  %v1318_v2 = vld [vmem:[#allocation3 + $0x30] sm:$0xff]  }
   0xf   :  { %1000 = vmatprep.subr.bf16.mxu0 %v1271_v0  ;;  %1020 = vmatprep.subr.bf16.mxu1 %v1271_v0  ;;  %vm162_vm1 = vcmask 1041408   ;;  %v1321_v3 = vld [vmem:[#allocation3 + $0x28] sm:$0xff]   ;;  %v42_v4 = vld [vmem:[%s1558_s1] sm:$0x3]  ;;  %vm158_vm2 = vcmask 31744   ;;  %v1339_v9 = vld [vmem:[#allocation3 + $0x20] sm:$0xff]  }
  0x10   :  { %1022 = vmatprep.mubr.msk.bf16.mxu1 %vm1272_vm0, %v1271_v0  ;;  %1016 = vmatprep.mubr.msk.bf16.mxu0 %vm1272_vm0, %v1271_v0  ;;  %v1328_v5 = vsel %vm162_vm1, %v42_v4, 0  ;;  %v67_v6 = vld [vmem:[%s1557_s0] sm:$0x3]  ;;  %v1354_v11 = vld [vmem:[#allocation3 + $0x10] sm:$0xff]   ;;  %v1360_v12 = vld [vmem:[#allocation3 + $0x8] sm:$0xff]  }
  0x11   :  { %1001 = vmatpush3.bf16.msra.mxu0 %v1315_v1  ;;  %1021 = vmatpush3.bf16.msra.mxu1 %v1328_v5  ;;  %v68_v7 = vpack.c.bf16 %v67_v6, %v67_v6  ;;  %v40_v8 = vld [vmem:[%s1561_s4] sm:$0x3]  ;;  %v1366_v13 = vld [vmem:[#allocation3] sm:$0xff]  }
  0x12   :  { %1002 = vmatprep.subr.bf16.mxu0 %v1271_v0  ;;  %41 = vst [vmem:[#allocation2] sm:$0x3] %v40_v8  ;;  %1026 = vmatprep.subr.bf16.mxu1 %v1271_v0  ;;  %v1348_v10 = vld [vmem:[#allocation3 + $0x18] sm:$0xff]   ;;  %v898_v16 = vld [vmem:[%s1557_s0 + $0x2] sm:$0x3] }
  0x13   :  { %v214_v17 = vpack.c.bf16 %v898_v16, %v898_v16  ;;  %v1394_v22 = vld [vmem:[%s1560_s3] ss:$0 sm:$0xff]  ;;  %v900_v38 = vld [vmem:[%s1557_s0 + $0x4] sm:$0x3]  ;;  %v902_v55 = vld [vmem:[%s1557_s0 + $0x6] sm:$0x3] }
  0x14   :  { %1023 = vmatmul.mubr.msk.bf16.vlgmr.msra.gmra.mxu1 %vm158_vm2, %v68_v7  ;;  %v308_v39 = vpack.c.bf16 %v900_v38, %v900_v38  ;;  %v402_v56 = vpack.c.bf16 %v902_v55, %v902_v55 }
  0x15   :  { %1003 = vmatpush3.bf16.msra.mxu0 %v1318_v2  ;;  %1027 = vmatpush3.bf16.msra.mxu1 %v1315_v1 }
  0x16   :  { %1004 = vmatprep.subr.bf16.mxu0 %v1271_v0  ;;  %1042 = vmatprep.mubr.msk.bf16.mxu1 %vm1272_vm0, %v1271_v0 }
  0x17   :  { %1028 = vmatprep.subr.bf16.mxu1 %v1271_v0 }
  0x19   :  { %1005 = vmatpush3.bf16.msra.mxu0 %v1321_v3  ;;  %1029 = vmatpush3.bf16.msra.mxu1 %v1318_v2  ;;  %v66_v14 = vld [vmem:[#allocation2] sm:$0x3] }
  0x1a   :  { %1006 = vmatprep.subr.bf16.mxu0 %v1271_v0  ;;  %1030 = vmatprep.subr.bf16.mxu1 %v1271_v0  ;;  %v69_v15 = vpack.c.bf16 %v66_v14, %v66_v14 }
  0x1d   :  { %1007 = vmatpush3.bf16.msra.mxu0 %v1339_v9  ;;  %1031 = vmatpush3.bf16.msra.mxu1 %v1321_v3 }
  0x1e   :  { %1008 = vmatprep.subr.bf16.mxu0 %v1271_v0  ;;  %1032 = vmatprep.subr.bf16.mxu1 %v1271_v0 }
  0x21   :  { %1009 = vmatpush3.bf16.msra.mxu0 %v1348_v10  ;;  %1033 = vmatpush3.bf16.msra.mxu1 %v1339_v9 }
  0x22   :  { %1010 = vmatprep.subr.bf16.mxu0 %v1271_v0  ;;  %1034 = vmatprep.subr.bf16.mxu1 %v1271_v0 }
  0x25   :  { %1011 = vmatpush3.bf16.msra.mxu0 %v1354_v11  ;;  %1035 = vmatpush3.bf16.msra.mxu1 %v1348_v10 }
  0x26   :  { %1012 = vmatprep.subr.bf16.mxu0 %v1271_v0  ;;  %1036 = vmatprep.subr.bf16.mxu1 %v1271_v0 }
  0x29   :  { %1013 = vmatpush3.bf16.msra.mxu0 %v1360_v12  ;;  %1037 = vmatpush3.bf16.msra.mxu1 %v1354_v11 }
  0x2a   :  { %1014 = vmatprep.subr.bf16.mxu0 %v1271_v0  ;;  %1038 = vmatprep.subr.bf16.mxu1 %v1271_v0 }
  0x2d   :  { %1015 = vmatpush3.bf16.msra.mxu0 %v1366_v13  ;;  %1039 = vmatpush3.bf16.msra.mxu1 %v1360_v12 }
  0x2e   :  { %1046 = vmatprep.subr.bf16.mxu0 %v1271_v0  ;;  %1040 = vmatprep.subr.bf16.mxu1 %v1271_v0 }
  0x30   :  { %1017 = vmatmul.mubr.bf16.vlgmr.msra.gmra.mxu0 %v69_v15 }
  0x31   :  { %1047 = vmatpush3.bf16.msra.mxu0 %v1328_v5  ;;  %1048 = vmatprep.mubr.msk.bf16.mxu0 %vm1272_vm0, %v1271_v0 }
  0x32   :  { %1072 = vmatprep.subr.bf16.mxu0 %v1271_v0  ;;  %1041 = vmatpush3.bf16.msra.mxu1 %v1366_v13 }
  0x33   :  { %1052 = vmatprep.subr.bf16.mxu1 %v1271_v0 }
  0x38   :  { %1049 = vmatmul.mubr.msk.bf16.vlgmr.msra.gmra.mxu0 %vm158_vm2, %v214_v17 }
  0x39   :  { %1073 = vmatpush3.bf16.msra.mxu0 %v1328_v5  ;;  %1074 = vmatprep.mubr.msk.bf16.mxu0 %vm1272_vm0, %v1271_v0 }
  0x3a   :  { %1078 = vmatprep.subr.bf16.mxu0 %v1271_v0 }
  0x40   :  { %1075 = vmatmul.mubr.msk.bf16.vlgmr.msra.gmra.mxu0 %vm158_vm2, %v308_v39 }
  0x41   :  { %1079 = vmatpush3.bf16.msra.mxu0 %v1315_v1  ;;  %1094 = vmatprep.mubr.msk.bf16.mxu0 %vm1272_vm0, %v1271_v0 }
  0x42   :  { %1080 = vmatprep.subr.bf16.mxu0 %v1271_v0 }
  0x45   :  { %1081 = vmatpush3.bf16.msra.mxu0 %v1318_v2 }
  0x46   :  { %1082 = vmatprep.subr.bf16.mxu0 %v1271_v0 }
  0x49   :  { %1083 = vmatpush3.bf16.msra.mxu0 %v1321_v3 }
  0x4a   :  { %1084 = vmatprep.subr.bf16.mxu0 %v1271_v0 }
  0x4d   :  { %1085 = vmatpush3.bf16.msra.mxu0 %v1339_v9 }
  0x4e   :  { %1086 = vmatprep.subr.bf16.mxu0 %v1271_v0 }
  0x51   :  { %1087 = vmatpush3.bf16.msra.mxu0 %v1348_v10 }
  0x52   :  { %1088 = vmatprep.subr.bf16.mxu0 %v1271_v0 }
  0x55   :  { %1089 = vmatpush3.bf16.msra.mxu0 %v1354_v11 }
  0x56   :  { %1090 = vmatprep.subr.bf16.mxu0 %v1271_v0 }
  0x59   :  { %1091 = vmatpush3.bf16.msra.mxu0 %v1360_v12 }
  0x5a   :  { %1092 = vmatprep.subr.bf16.mxu0 %v1271_v0 }
  0x5d   :  { %1093 = vmatpush3.bf16.msra.mxu0 %v1366_v13 }
  0x5e   :  { %1124 = vmatprep.subr.bf16.mxu0 %v1271_v0 }
  0xd4   :  { %v200_v18 = vpop.f32.mrf.mxu1 }
  0xd6   :  { %v1024_v19 = vpop.f32.mrf.mxu1 }
  0xd8   :  { %v203_v20 = vpop.f32.mrf.mxu1 }
  0xda   :  { %v1025_v21 = vpop.f32.mrf.mxu1 }
  0xf0   :  { %v152_v23 = vpop.f32.mrf.mxu0 }
  0xf1   :  { %v201_v24 = vadd.f32 %v200_v18, %v152_v23  ;;  %v904_v18 = vld [vmem:[%s1557_s0 + $0x8] sm:$0x3] }
  0xf2   :  { %v1018_v25 = vpop.f32.mrf.mxu0  ;;  %v496_v19 = vpack.c.bf16 %v904_v18, %v904_v18 }
  0xf3   :  { %v206_v26 = vadd.f32 %v1394_v22, %v201_v24 }
  0xf4   :  { %v155_v27 = vpop.f32.mrf.mxu0 }
  0xf5   :  { %v207_v28 = vmax.f32 %v206_v26, 0.0 }
  0xf6   :  { %v1019_v29 = vpop.f32.mrf.mxu0 }
  0xf7   :  { %v208_v30 = vsub.f32 %v207_v28, %v66_v14 }
  0xf8   :  { %v293_v34 = vpop.f32.mrf.mxu0 }
  0xf9   :  { %v209_v31 = vmul.f32 0.2, %v208_v30 }
  0xfa   :  { %v1050_v35 = vpop.f32.mrf.mxu0 }
  0xfb   :  { %v210_v32 = vadd.f32 %v209_v31, %v66_v14 }
  0xfc   :  { %v296_v36 = vpop.f32.mrf.mxu0 }
  0xfd   :  { %211 = vst [vmem:[#allocation6] sm:$0x3] %v210_v32  ;;  %v215_v33 = vpack.c.bf16 %v210_v32, %v210_v32  ;;  %v906_v36 = vld [vmem:[%s1557_s0 + $0xa] sm:$0x3] }
  0xfe   :  { %v1051_v37 = vpop.f32.mrf.mxu0 }
  0xff   :  { %1043 = vmatmul.mubr.bf16.vlgmr.msra.gmra.mxu1 %v215_v33  ;;  %v590_v37 = vpack.c.bf16 %v906_v36, %v906_v36 }
 0x100   :  { %1053 = vmatpush3.bf16.msra.mxu1 %v1315_v1  ;;  %1068 = vmatprep.mubr.msk.bf16.mxu1 %vm1272_vm0, %v1271_v0  ;;  %v387_v51 = vpop.f32.mrf.mxu0 }
 0x101   :  { %1054 = vmatprep.subr.bf16.mxu1 %v1271_v0 }
 0x102   :  { %v1076_v52 = vpop.f32.mrf.mxu0 }
 0x104   :  { %1055 = vmatpush3.bf16.msra.mxu1 %v1318_v2  ;;  %v390_v53 = vpop.f32.mrf.mxu0 }
 0x105   :  { %1056 = vmatprep.subr.bf16.mxu1 %v1271_v0  ;;  %v908_v53 = vld [vmem:[%s1557_s0 + $0xc] sm:$0x3] }
 0x106   :  { %v1077_v54 = vpop.f32.mrf.mxu0 }
 0x107   :  { %v684_v54 = vpack.c.bf16 %v908_v53, %v908_v53 }
 0x108   :  { %1057 = vmatpush3.bf16.msra.mxu1 %v1321_v3 }
 0x109   :  { %1058 = vmatprep.subr.bf16.mxu1 %v1271_v0 }
 0x10c   :  { %1059 = vmatpush3.bf16.msra.mxu1 %v1339_v9 }
 0x10d   :  { %1060 = vmatprep.subr.bf16.mxu1 %v1271_v0 }
 0x110   :  { %1061 = vmatpush3.bf16.msra.mxu1 %v1348_v10 }
 0x111   :  { %1062 = vmatprep.subr.bf16.mxu1 %v1271_v0 }
 0x114   :  { %1063 = vmatpush3.bf16.msra.mxu1 %v1354_v11 }
 0x115   :  { %1064 = vmatprep.subr.bf16.mxu1 %v1271_v0 }
 0x118   :  { %1065 = vmatpush3.bf16.msra.mxu1 %v1360_v12 }
 0x119   :  { %1066 = vmatprep.subr.bf16.mxu1 %v1271_v0 }
 0x11c   :  { %1067 = vmatpush3.bf16.msra.mxu1 %v1366_v13 }
 0x11d   :  { %1098 = vmatprep.subr.bf16.mxu1 %v1271_v0 }
 0x1bf   :  { %v250_v40 = vpop.f32.mrf.mxu1 }
 0x1c0   :  { %v294_v41 = vadd.f32 %v293_v34, %v250_v40 }
 0x1c1   :  { %v1044_v42 = vpop.f32.mrf.mxu1 }
 0x1c2   :  { %v299_v43 = vadd.f32 %v1394_v22, %v294_v41 }
 0x1c3   :  { %v253_v44 = vpop.f32.mrf.mxu1 }
 0x1c4   :  { %v300_v45 = vmax.f32 %v299_v43, 0.0 }
 0x1c5   :  { %v1045_v46 = vpop.f32.mrf.mxu1 }
 0x1c6   :  { %v301_v47 = vsub.f32 %v300_v45, %v210_v32 }
 0x1c8   :  { %v302_v48 = vmul.f32 0.2, %v301_v47 }
 0x1ca   :  { %v303_v49 = vadd.f32 %v302_v48, %v210_v32 }
 0x1cc   :  { %305 = vst [vmem:[#allocation6 + $0x2] sm:$0x3] %v303_v49  ;;  %v309_v50 = vpack.c.bf16 %v303_v49, %v303_v49 }
 0x1ce   :  { %1069 = vmatmul.mubr.bf16.vlgmr.msra.gmra.mxu1 %v309_v50 }
 0x1cf   :  { %1099 = vmatpush3.bf16.msra.mxu1 %v1328_v5  ;;  %1100 = vmatprep.mubr.msk.bf16.mxu1 %vm1272_vm0, %v1271_v0 }
 0x1d0   :  { %1104 = vmatprep.subr.bf16.mxu1 %v1271_v0 }
 0x1d6   :  { %1101 = vmatmul.mubr.msk.bf16.vlgmr.msra.gmra.mxu1 %vm158_vm2, %v402_v56 }
 0x1d7   :  { %1105 = vmatpush3.bf16.msra.mxu1 %v1315_v1  ;;  %1120 = vmatprep.mubr.msk.bf16.mxu1 %vm1272_vm0, %v1271_v0 }
 0x1d8   :  { %1106 = vmatprep.subr.bf16.mxu1 %v1271_v0 }
 0x1db   :  { %1107 = vmatpush3.bf16.msra.mxu1 %v1318_v2 }
 0x1dc   :  { %1108 = vmatprep.subr.bf16.mxu1 %v1271_v0 }
 0x1df   :  { %1109 = vmatpush3.bf16.msra.mxu1 %v1321_v3 }
 0x1e0   :  { %1110 = vmatprep.subr.bf16.mxu1 %v1271_v0 }
 0x1e3   :  { %1111 = vmatpush3.bf16.msra.mxu1 %v1339_v9 }
 0x1e4   :  { %1112 = vmatprep.subr.bf16.mxu1 %v1271_v0 }
 0x1e7   :  { %1113 = vmatpush3.bf16.msra.mxu1 %v1348_v10 }
 0x1e8   :  { %1114 = vmatprep.subr.bf16.mxu1 %v1271_v0 }
 0x1eb   :  { %1115 = vmatpush3.bf16.msra.mxu1 %v1354_v11 }
 0x1ec   :  { %1116 = vmatprep.subr.bf16.mxu1 %v1271_v0 }
 0x1ef   :  { %1117 = vmatpush3.bf16.msra.mxu1 %v1360_v12 }
 0x1f0   :  { %1118 = vmatprep.subr.bf16.mxu1 %v1271_v0 }
 0x1f3   :  { %1119 = vmatpush3.bf16.msra.mxu1 %v1366_v13 }
 0x1f4   :  { %1150 = vmatprep.subr.bf16.mxu1 %v1271_v0 }
 0x28e   :  { %v344_v57 = vpop.f32.mrf.mxu1 }
 0x28f   :  { %v388_v58 = vadd.f32 %v387_v51, %v344_v57 }
 0x290   :  { %v1070_v59 = vpop.f32.mrf.mxu1 }
 0x291   :  { %v393_v60 = vadd.f32 %v1394_v22, %v388_v58 }
 0x292   :  { %v347_v61 = vpop.f32.mrf.mxu1 }
 0x293   :  { %v394_v62 = vmax.f32 %v393_v60, 0.0 }
 0x294   :  { %v1071_v63 = vpop.f32.mrf.mxu1 }
 0x295   :  { %v395_v4 = vsub.f32 %v394_v62, %v303_v49  ;;  %v910_v62 = vld [vmem:[%s1557_s0 + $0xe] sm:$0x3]  ;;  %s1273_s0 = smov [#allocation6]  }
 0x296   :  { %v481_v14 = vpop.f32.mrf.mxu1  ;;  %v778_v63 = vpack.c.bf16 %v910_v62, %v910_v62  ;;  %s876_s18 = sshll.u32 %s1273_s0, 4  ;;  %s877_s18 = int_to_ptr.vmem [resolvable:$true] %s876_s18 }
 0x297   :  { %v396_v6 = vmul.f32 0.2, %v395_v4  ;;  %s1244_s19 = scalar_lea.vmem %s877_s18, 256  ;;  %p1249_p6 = scmp.lt.s32.totalorder %s877_s18, %s877_s18 }
 0x298   :  { %v1102_v15 = vpop.f32.mrf.mxu1  ;;  %p1245_p5 = scmp.ne.s32.totalorder %s877_s18, %s1244_s19  ;;  %p1250_p7 = scmp.lt.s32.totalorder %s1244_s19, %s1244_s19 }
 0x299   :  { %v397_v7 = vadd.f32 %v396_v6, %v303_v49 }
 0x29a   :  { %v484_v16 = vpop.f32.mrf.mxu1  ;;  %p1251_p8 = por %p1250_p7, %p1249_p6 }
 0x29b   :  { %399 = vst [vmem:[#allocation6 + $0x4] sm:$0x3] %v397_v7  ;;  %v403_v8 = vpack.c.bf16 %v397_v7, %v397_v7 }
 0x29c   :  { %v1103_v17 = vpop.f32.mrf.mxu1  ;;  %p1252_p9 = pnand %p1251_p8, %p1245_p5 }
 0x29d   :  { %1095 = vmatmul.mubr.bf16.vlgmr.msra.gmra.mxu0 %v403_v8 }
 0x29e   :  { %1125 = vmatpush3.bf16.msra.mxu0 %v1328_v5  ;;  %1126 = vmatprep.mubr.msk.bf16.mxu0 %vm1272_vm0, %v1271_v0 }
 0x29f   :  { %1130 = vmatprep.subr.bf16.mxu0 %v1271_v0 }
 0x2a5   :  { %1127 = vmatmul.mubr.msk.bf16.vlgmr.msra.gmra.mxu0 %vm158_vm2, %v496_v19 }
 0x2a6   :  { %1131 = vmatpush3.bf16.msra.mxu0 %v1315_v1  ;;  %1146 = vmatprep.mubr.msk.bf16.mxu0 %vm1272_vm0, %v1271_v0 }
 0x2a7   :  { %1132 = vmatprep.subr.bf16.mxu0 %v1271_v0 }
 0x2aa   :  { %1133 = vmatpush3.bf16.msra.mxu0 %v1318_v2 }
 0x2ab   :  { %1134 = vmatprep.subr.bf16.mxu0 %v1271_v0 }
 0x2ae   :  { %1135 = vmatpush3.bf16.msra.mxu0 %v1321_v3 }
 0x2af   :  { %1136 = vmatprep.subr.bf16.mxu0 %v1271_v0 }
 0x2b2   :  { %1137 = vmatpush3.bf16.msra.mxu0 %v1339_v9 }
 0x2b3   :  { %1138 = vmatprep.subr.bf16.mxu0 %v1271_v0 }
 0x2b6   :  { %1139 = vmatpush3.bf16.msra.mxu0 %v1348_v10 }
 0x2b7   :  { %1140 = vmatprep.subr.bf16.mxu0 %v1271_v0 }
 0x2ba   :  { %1141 = vmatpush3.bf16.msra.mxu0 %v1354_v11 }
 0x2bb   :  { %1142 = vmatprep.subr.bf16.mxu0 %v1271_v0 }
 0x2be   :  { %1143 = vmatpush3.bf16.msra.mxu0 %v1360_v12 }
 0x2bf   :  { %1144 = vmatprep.subr.bf16.mxu0 %v1271_v0 }
 0x2c2   :  { %1145 = vmatpush3.bf16.msra.mxu0 %v1366_v13 }
 0x2c3   :  { %1176 = vmatprep.subr.bf16.mxu0 %v1271_v0 }
 0x35d   :  { %v438_v20 = vpop.f32.mrf.mxu0 }
 0x35e   :  { %v482_v21 = vadd.f32 %v481_v14, %v438_v20 }
 0x35f   :  { %v1096_v23 = vpop.f32.mrf.mxu0 }
 0x360   :  { %v487_v24 = vadd.f32 %v1394_v22, %v482_v21 }
 0x361   :  { %v441_v25 = vpop.f32.mrf.mxu0 }
 0x362   :  { %v488_v26 = vmax.f32 %v487_v24, 0.0 }
 0x363   :  { %v1097_v27 = vpop.f32.mrf.mxu0 }
 0x364   :  { %v489_v28 = vsub.f32 %v488_v26, %v397_v7 }
 0x365   :  { %v575_v32 = vpop.f32.mrf.mxu0 }
 0x366   :  { %v490_v29 = vmul.f32 0.2, %v489_v28 }
 0x367   :  { %v1128_v33 = vpop.f32.mrf.mxu0 }
 0x368   :  { %v491_v30 = vadd.f32 %v490_v29, %v397_v7 }
 0x369   :  { %v578_v34 = vpop.f32.mrf.mxu0 }
 0x36a   :  { %493 = vst [vmem:[#allocation6 + $0x6] sm:$0x3] %v491_v30  ;;  %v497_v31 = vpack.c.bf16 %v491_v30, %v491_v30 }
 0x36b   :  { %v1129_v35 = vpop.f32.mrf.mxu0 }
 0x36c   :  { %1121 = vmatmul.mubr.bf16.vlgmr.msra.gmra.mxu1 %v497_v31 }
 0x36d   :  { %1151 = vmatpush3.bf16.msra.mxu1 %v1328_v5  ;;  %1152 = vmatprep.mubr.msk.bf16.mxu1 %vm1272_vm0, %v1271_v0 }
 0x36e   :  { %1156 = vmatprep.subr.bf16.mxu1 %v1271_v0 }
 0x374   :  { %1153 = vmatmul.mubr.msk.bf16.vlgmr.msra.gmra.mxu1 %vm158_vm2, %v590_v37 }
 0x375   :  { %1157 = vmatpush3.bf16.msra.mxu1 %v1315_v1  ;;  %1172 = vmatprep.mubr.msk.bf16.mxu1 %vm1272_vm0, %v1271_v0 }
 0x376   :  { %1158 = vmatprep.subr.bf16.mxu1 %v1271_v0 }
 0x379   :  { %1159 = vmatpush3.bf16.msra.mxu1 %v1318_v2 }
 0x37a   :  { %1160 = vmatprep.subr.bf16.mxu1 %v1271_v0 }
 0x37d   :  { %1161 = vmatpush3.bf16.msra.mxu1 %v1321_v3 }
 0x37e   :  { %1162 = vmatprep.subr.bf16.mxu1 %v1271_v0 }
 0x381   :  { %1163 = vmatpush3.bf16.msra.mxu1 %v1339_v9 }
 0x382   :  { %1164 = vmatprep.subr.bf16.mxu1 %v1271_v0 }
 0x385   :  { %1165 = vmatpush3.bf16.msra.mxu1 %v1348_v10 }
 0x386   :  { %1166 = vmatprep.subr.bf16.mxu1 %v1271_v0 }
 0x389   :  { %1167 = vmatpush3.bf16.msra.mxu1 %v1354_v11 }
 0x38a   :  { %1168 = vmatprep.subr.bf16.mxu1 %v1271_v0 }
 0x38d   :  { %1169 = vmatpush3.bf16.msra.mxu1 %v1360_v12 }
 0x38e   :  { %1170 = vmatprep.subr.bf16.mxu1 %v1271_v0 }
 0x391   :  { %1171 = vmatpush3.bf16.msra.mxu1 %v1366_v13 }
 0x392   :  { %1202 = vmatprep.subr.bf16.mxu1 %v1271_v0 }
 0x42c   :  { %v532_v38 = vpop.f32.mrf.mxu1 }
 0x42d   :  { %v576_v39 = vadd.f32 %v575_v32, %v532_v38 }
 0x42e   :  { %v1122_v40 = vpop.f32.mrf.mxu1 }
 0x42f   :  { %v581_v41 = vadd.f32 %v1394_v22, %v576_v39 }
 0x430   :  { %v535_v42 = vpop.f32.mrf.mxu1 }
 0x431   :  { %v582_v43 = vmax.f32 %v581_v41, 0.0 }
 0x432   :  { %v1123_v44 = vpop.f32.mrf.mxu1 }
 0x433   :  { %v583_v45 = vsub.f32 %v582_v43, %v491_v30 }
 0x434   :  { %v669_v49 = vpop.f32.mrf.mxu1 }
 0x435   :  { %v584_v46 = vmul.f32 0.2, %v583_v45 }
 0x436   :  { %v1154_v50 = vpop.f32.mrf.mxu1 }
 0x437   :  { %v585_v47 = vadd.f32 %v584_v46, %v491_v30 }
 0x438   :  { %v672_v51 = vpop.f32.mrf.mxu1 }
 0x439   :  { %587 = vst [vmem:[#allocation6 + $0x8] sm:$0x3] %v585_v47  ;;  %v591_v48 = vpack.c.bf16 %v585_v47, %v585_v47 }
 0x43a   :  { %v1155_v52 = vpop.f32.mrf.mxu1 }
 0x43b   :  { %1147 = vmatmul.mubr.bf16.vlgmr.msra.gmra.mxu0 %v591_v48 }
 0x43c   :  { %1177 = vmatpush3.bf16.msra.mxu0 %v1328_v5  ;;  %1178 = vmatprep.mubr.msk.bf16.mxu0 %vm1272_vm0, %v1271_v0 }
 0x43d   :  { %1182 = vmatprep.subr.bf16.mxu0 %v1271_v0 }
 0x443   :  { %1179 = vmatmul.mubr.msk.bf16.vlgmr.msra.gmra.mxu0 %vm158_vm2, %v684_v54 }
 0x444   :  { %1183 = vmatpush3.bf16.msra.mxu0 %v1315_v1  ;;  %1198 = vmatprep.mubr.msk.bf16.mxu0 %vm1272_vm0, %v1271_v0 }
 0x445   :  { %1184 = vmatprep.subr.bf16.mxu0 %v1271_v0 }
 0x448   :  { %1185 = vmatpush3.bf16.msra.mxu0 %v1318_v2 }
 0x449   :  { %1186 = vmatprep.subr.bf16.mxu0 %v1271_v0 }
 0x44c   :  { %1187 = vmatpush3.bf16.msra.mxu0 %v1321_v3 }
 0x44d   :  { %1188 = vmatprep.subr.bf16.mxu0 %v1271_v0 }
 0x450   :  { %1189 = vmatpush3.bf16.msra.mxu0 %v1339_v9 }
 0x451   :  { %1190 = vmatprep.subr.bf16.mxu0 %v1271_v0 }
 0x454   :  { %1191 = vmatpush3.bf16.msra.mxu0 %v1348_v10 }
 0x455   :  { %1192 = vmatprep.subr.bf16.mxu0 %v1271_v0 }
 0x458   :  { %1193 = vmatpush3.bf16.msra.mxu0 %v1354_v11 }
 0x459   :  { %1194 = vmatprep.subr.bf16.mxu0 %v1271_v0 }
 0x45c   :  { %1195 = vmatpush3.bf16.msra.mxu0 %v1360_v12 }
 0x45d   :  { %1196 = vmatprep.subr.bf16.mxu0 %v1271_v0 }
 0x460   :  { %1197 = vmatpush3.bf16.msra.mxu0 %v1366_v13 }
 0x4fb   :  { %v626_v1 = vpop.f32.mrf.mxu0 }
 0x4fc   :  { %v670_v2 = vadd.f32 %v669_v49, %v626_v1 }
 0x4fd   :  { %v1148_v3 = vpop.f32.mrf.mxu0 }
 0x4fe   :  { %v675_v9 = vadd.f32 %v1394_v22, %v670_v2 }
 0x4ff   :  { %v629_v55 = vpop.f32.mrf.mxu0 }
 0x500   :  { %v676_v56 = vmax.f32 %v675_v9, 0.0 }
 0x501   :  { %v1149_v10 = vpop.f32.mrf.mxu0 }
 0x502   :  { %v677_v57 = vsub.f32 %v676_v56, %v585_v47 }
 0x503   :  { %v763_v12 = vpop.f32.mrf.mxu0 }
 0x504   :  { %v678_v58 = vmul.f32 0.2, %v677_v57 }
 0x505   :  { %v1180_v13 = vpop.f32.mrf.mxu0 }
 0x506   :  { %v679_v59 = vadd.f32 %v678_v58, %v585_v47 }
 0x507   :  { %v766_v60 = vpop.f32.mrf.mxu0 }
 0x508   :  { %681 = vst [vmem:[#allocation6 + $0xa] sm:$0x3] %v679_v59  ;;  %v685_v11 = vpack.c.bf16 %v679_v59, %v679_v59 }
 0x509   :  { %v1181_v61 = vpop.f32.mrf.mxu0 }
 0x50a   :  { %1173 = vmatmul.mubr.bf16.vlgmr.msra.gmra.mxu1 %v685_v11 }
 0x50b   :  { %1203 = vmatpush3.bf16.msra.mxu1 %v1328_v5  ;;  %1204 = vmatprep.mubr.msk.bf16.mxu1 %vm1272_vm0, %v1271_v0 }
 0x512   :  { %1205 = vmatmul.mubr.msk.bf16.vlgmr.msra.gmra.mxu1 %vm158_vm2, %v778_v63 }
 0x5ca   :  { %v720_v4 = vpop.f32.mrf.mxu1 }
 0x5cb   :  { %v764_v6 = vadd.f32 %v763_v12, %v720_v4 }
 0x5cc   :  { %v1174_v7 = vpop.f32.mrf.mxu1 }
 0x5cd   :  { %v769_v8 = vadd.f32 %v1394_v22, %v764_v6 }
 0x5ce   :  { %v723_v5 = vpop.f32.mrf.mxu1 }
 0x5cf   :  { %v770_v14 = vmax.f32 %v769_v8, 0.0 }
 0x5d0   :  { %v1175_v15 = vpop.f32.mrf.mxu1 }
 0x5d1   :  { %v771_v0 = vsub.f32 %v770_v14, %v679_v59 }
 0x5d2   :  { %v857_v19 = vpop.f32.mrf.mxu1 }
 0x5d3   :  { %v772_v16 = vmul.f32 0.2, %v771_v0 }
 0x5d4   :  { %v1206_v20 = vpop.f32.mrf.mxu1 }
 0x5d5   :  { %v773_v17 = vadd.f32 %v772_v16, %v679_v59 }
 0x5d6   :  { %v860_v21 = vpop.f32.mrf.mxu1 }
 0x5d7   :  { %775 = vst [vmem:[#allocation6 + $0xc] sm:$0x3] %v773_v17  ;;  %v779_v18 = vpack.c.bf16 %v773_v17, %v773_v17 }
 0x5d8   :  { %v1207_v23 = vpop.f32.mrf.mxu1 }
 0x5d9   :  { %1199 = vmatmul.mubr.bf16.vlgmr.msra.gmra.mxu0 %v779_v18 }
 0x699   :  { %v814_v24 = vpop.f32.mrf.mxu0 }
 0x69a   :  { %v858_v25 = vadd.f32 %v857_v19, %v814_v24 }
 0x69b   :  { %v1200_v26 = vpop.f32.mrf.mxu0 }
 0x69c   :  { %v863_v27 = vadd.f32 %v1394_v22, %v858_v25 }
 0x69d   :  { %v817_v28 = vpop.f32.mrf.mxu0 }
 0x69e   :  { %v864_v29 = vmax.f32 %v863_v27, 0.0 }
 0x69f   :  { %v1201_v30 = vpop.f32.mrf.mxu0 }
 0x6a0   :  { %v865_v31 = vsub.f32 %v864_v29, %v773_v17 }
 0x6a2   :  { %v866_v32 = vmul.f32 0.2, %v865_v31 }
 0x6a4   :  { %v867_v33 = vadd.f32 %v866_v32, %v773_v17 }
 0x6a6   :  { %869 = vst [vmem:[#allocation6 + $0xe] sm:$0x3] %v867_v33  ;;  %870 = vst [vmem:[#allocation2] sm:$0x3] %v867_v33 }
 0x6a7   :  { %1255 = shalt.err (!%p1252_p9)
}
 0x6a8   :  { %s1274_s20 = smov 32   ;;  %s1275_s21 = smov 2  }
 0x6a9   :  { %882 = dma.vmem_to_hbm [thread:$0]  %s877_s18, 256, %s1562_s5, [#allocation5], %s1274_s20, %s1274_s20, %s1275_s21  }
 0x6aa   :  { %1266 = dma.done.wait [#allocation5], 256  }
 0x6ab   :  { %1267 = vsyncadd [#allocation5], 4294967040 }
 0x6ac   :  { %886 = vsyncpa [#allocation4], 1 }
 0x6ad   :  { %887 = vsyncpa [#allocation5], 1 }

</bundles_post_ra>
